<compile_context>
chip_gen: v7x
topology: tpu7x:2x2x1
jax: 0.10.0
libtpu: 0.0.40
codegen_flags: <defaults>
</compile_context>

<pallas_src>
import functools
import numpy as np

import jax
import jax.numpy as jnp
from jax.experimental import pallas as pl
from jax.experimental.pallas import tpu as pltpu


_LANES = 128
_MAX_ONESTEP_ROWS = 4096   # packed path: 4096*128*4B = 2 MiB / input tile
_TILE_ROWS = 2048          # packed path multi-step tile
_MAX_ONESTEP_N = 2048      # multi-label path single-step row cap
_TILE_N = 2048             # multi-label path multi-step tile


def _round_up(x, mult):
    return ((x + mult - 1) // mult) * mult


# ----------------------------------------------------------------------------
# Single-label kernels: lane-packed streaming hinge over (rows, 128) f32.
# ----------------------------------------------------------------------------
def _packed_hinge(u, t, *, m, apply_t, n_elems, n_pad_elems, tile_rows):
    if apply_t:                                   # '-T' in config['info']
        u = jnp.where(jnp.abs(u) > m, jnp.sign(u), 0.0)
    hinge = jnp.maximum(m - u * t, 0.0)
    if n_pad_elems != n_elems:                    # mask padded flat elements
        row = (jax.lax.broadcasted_iota(jnp.int32, hinge.shape, 0)
               + pl.program_id(0) * tile_rows)
        col = jax.lax.broadcasted_iota(jnp.int32, hinge.shape, 1)
        hinge = jnp.where(row * _LANES + col < n_elems, hinge, 0.0)
    return hinge


def _single_onestep_kernel(u_ref, t_ref, out_ref, *,
                           m, apply_t, n_elems, n_pad_elems, tile_rows):
    hinge = _packed_hinge(u_ref[...], t_ref[...], m=m, apply_t=apply_t,
                          n_elems=n_elems, n_pad_elems=n_pad_elems,
                          tile_rows=tile_rows)
    out_ref[...] = jnp.sum(hinge, keepdims=True)          # single (1,1) store


def _single_multistep_kernel(u_ref, t_ref, out_ref, acc_ref, *,
                             m, apply_t, n_elems, n_pad_elems, tile_rows):
    @pl.when(pl.program_id(0) == 0)
    def _():
        acc_ref[...] = jnp.zeros_like(acc_ref)

    hinge = _packed_hinge(u_ref[...], t_ref[...], m=m, apply_t=apply_t,
                          n_elems=n_elems, n_pad_elems=n_pad_elems,
                          tile_rows=tile_rows)
    # natural vreg decomposition: cheap cross-vreg VPU adds into an (8,128) acc
    acc_ref[...] += hinge.reshape(tile_rows // 8, 8, _LANES).sum(axis=0)

    @pl.when(pl.program_id(0) == pl.num_programs(0) - 1)
    def _():
        out_ref[...] = jnp.sum(acc_ref[...], keepdims=True)


# ----------------------------------------------------------------------------
# Multi-label kernels: cs = y @ tv on the MXU, hinge on the VPU.
# ----------------------------------------------------------------------------
def _multi_hinge(u_ref, y_ref, tv_ref, rc_ref, *, m, apply_t, n_valid,
                 n_pad, tile_n):
    u = u_ref[...]                                         # (tile_n, bit) f32
    if apply_t:
        u = jnp.where(jnp.abs(u) > m, jnp.sign(u), 0.0)

    cs = jnp.dot(y_ref[...], tv_ref[...],
                 preferred_element_type=jnp.float32)       # exact small ints
    cs = jnp.where(cs == 0.0, jnp.broadcast_to(rc_ref[...], cs.shape), cs)
    # t = 2*(cs>0)-1  and  u*t  fused into a single select:
    hinge = jnp.maximum(m - jnp.where(cs > 0.0, u, -u), 0.0)
    if n_pad != n_valid:                                   # mask padded rows
        row = (jax.lax.broadcasted_iota(jnp.int32, hinge.shape, 0)
               + pl.program_id(0) * tile_n)
        hinge = jnp.where(row < n_valid, hinge, 0.0)
    return hinge


def _multi_onestep_kernel(u_ref, y_ref, tv_ref, rc_ref, out_ref, *,
                          m, apply_t, n_valid, n_pad, tile_n):
    hinge = _multi_hinge(u_ref, y_ref, tv_ref, rc_ref, m=m, apply_t=apply_t,
                         n_valid=n_valid, n_pad=n_pad, tile_n=tile_n)
    out_ref[...] = jnp.sum(hinge, keepdims=True)


def _multi_multistep_kernel(u_ref, y_ref, tv_ref, rc_ref, out_ref, acc_ref, *,
                            m, apply_t, n_valid, n_pad, tile_n):
    @pl.when(pl.program_id(0) == 0)
    def _():
        acc_ref[...] = jnp.zeros_like(acc_ref)

    hinge = _multi_hinge(u_ref, y_ref, tv_ref, rc_ref, m=m, apply_t=apply_t,
                         n_valid=n_valid, n_pad=n_pad, tile_n=tile_n)
    bit = hinge.shape[1]
    acc_ref[...] += hinge.reshape(tile_n // 8, 8, bit).sum(axis=0)

    @pl.when(pl.program_id(0) == pl.num_programs(0) - 1)
    def _():
        out_ref[...] = jnp.sum(acc_ref[...], keepdims=True)


# ----------------------------------------------------------------------------
# Pallas-call wrappers for the two paths
# ----------------------------------------------------------------------------
def _packed_hinge_sum(u, t, *, m, apply_t):
    """Sum of max(m - u*t, 0) over all elements, lane-packed to (rows, 128)."""
    N, bit = u.shape
    n_elems = N * bit
    n_rows = _round_up(pl.cdiv(n_elems, _LANES), 8)

    if n_rows <= _MAX_ONESTEP_ROWS:
        tile_rows = n_rows
    else:
        tile_rows = _TILE_ROWS
        n_rows = _round_up(n_rows, tile_rows)
    n_pad_elems = n_rows * _LANES
    grid = (n_rows // tile_rows,)

    u_flat = u.reshape(-1)
    t_flat = t.reshape(-1)
    if n_pad_elems != n_elems:
        u_flat = jnp.pad(u_flat, (0, n_pad_elems - n_elems))
        t_flat = jnp.pad(t_flat, (0, n_pad_elems - n_elems))
    u2 = u_flat.reshape(n_rows, _LANES)
    t2 = t_flat.reshape(n_rows, _LANES)

    common = dict(m=m, apply_t=bool(apply_t), n_elems=n_elems,
                  n_pad_elems=n_pad_elems, tile_rows=tile_rows)
    if grid[0] == 1:        # common case: no accumulator, no RMW passes
        kernel = functools.partial(_single_onestep_kernel, **common)
        scratch = []
    else:
        kernel = functools.partial(_single_multistep_kernel, **common)
        scratch = [pltpu.VMEM((8, _LANES), jnp.float32)]

    out = pl.pallas_call(
        kernel,
        out_shape=jax.ShapeDtypeStruct((1, 1), jnp.float32),
        grid_spec=pltpu.PrefetchScalarGridSpec(
            num_scalar_prefetch=0,
            grid=grid,
            in_specs=[pl.BlockSpec((tile_rows, _LANES), lambda i: (i, 0)),
                      pl.BlockSpec((tile_rows, _LANES), lambda i: (i, 0))],
            out_specs=pl.BlockSpec((1, 1), lambda i: (0, 0)),
            scratch_shapes=scratch,
        ),
        compiler_params=pltpu.CompilerParams(
            dimension_semantics=("arbitrary",)),   # shared (1,1) output
    )(u2, t2)
    return out[0, 0]


def _multi_label_hinge_sum(u, y_f32, target_vectors, random_center, *,
                           m, apply_t):
    N, bit = u.shape
    C = y_f32.shape[1]

    n8 = _round_up(N, 8)
    tile_n = n8 if n8 <= _MAX_ONESTEP_N else _TILE_N
    n_pad = _round_up(N, tile_n)
    grid = (n_pad // tile_n,)

    # bf16 MXU operands: exact since y is 0/1 and tv is ±1 (f32 accumulation).
    y_k = y_f32.astype(jnp.bfloat16)
    tv_bf16 = target_vectors.astype(jnp.bfloat16)
    rc = random_center.reshape(1, bit).astype(jnp.float32)

    u_k = u
    if n_pad != N:
        u_k = jnp.pad(u_k, ((0, n_pad - N), (0, 0)))
        y_k = jnp.pad(y_k, ((0, n_pad - N), (0, 0)))

    common = dict(m=m, apply_t=bool(apply_t), n_valid=N, n_pad=n_pad,
                  tile_n=tile_n)
    if grid[0] == 1:
        kernel = functools.partial(_multi_onestep_kernel, **common)
        scratch = []
    else:
        kernel = functools.partial(_multi_multistep_kernel, **common)
        scratch = [pltpu.VMEM((8, bit), jnp.float32)]

    out = pl.pallas_call(
        kernel,
        out_shape=jax.ShapeDtypeStruct((1, 1), jnp.float32),
        grid_spec=pltpu.PrefetchScalarGridSpec(
            num_scalar_prefetch=0,
            grid=grid,
            in_specs=[pl.BlockSpec((tile_n, bit), lambda i: (i, 0)),   # u f32
                      pl.BlockSpec((tile_n, C),   lambda i: (i, 0)),   # y bf16
                      pl.BlockSpec((C, bit),      lambda i: (0, 0)),   # tv bf16
                      pl.BlockSpec((1, bit),      lambda i: (0, 0))],  # rc f32
            out_specs=pl.BlockSpec((1, 1), lambda i: (0, 0)),
            scratch_shapes=scratch,
        ),
        compiler_params=pltpu.CompilerParams(
            dimension_semantics=("arbitrary",)),
    )(u_k, y_k, tv_bf16, rc)
    return out[0, 0]


# ----------------------------------------------------------------------------
# Public forward (mirrors DPNLoss.forward).  U/Y donated -> in-place scatter.
# ----------------------------------------------------------------------------
@functools.partial(jax.jit,
                   static_argnames=("m", "is_single_label", "apply_t"),
                   donate_argnames=("U", "Y"))
def dpn_loss_forward(u, y, ind, U, Y, target_vectors, random_center, *,
                     m, is_single_label, apply_t=False):
    """Returns (polarization_loss, new_U, new_Y)."""
    u = u.astype(jnp.float32)
    y_f32 = y.astype(jnp.float32)

    # State updates (glue): self.U[ind] = u ; self.Y[ind] = y
    U = U.at[ind].set(u)
    Y = Y.at[ind].set(y_f32)

    N, bit = u.shape
    m = float(m)

    if is_single_label:
        # Wrapper-side gather: t = target_vectors[argmax(y, 1)]  (tiny).
        # The kernel then streams u/t only — no one-hot, no MXU-as-gather.
        t = jnp.take(target_vectors.astype(jnp.float32),
                     jnp.argmax(y_f32, axis=1), axis=0)
        loss_sum = _packed_hinge_sum(u, t, m=m, apply_t=apply_t)
    else:
        loss_sum = _multi_label_hinge_sum(u, y_f32, target_vectors,
                                          random_center, m=m, apply_t=apply_t)

    loss = loss_sum / jnp.float32(N * bit)     # .mean() over (N, bit)
    return loss, U, Y


# ----------------------------------------------------------------------------
# Deterministic parameter construction (mirrors DPNLoss.__init__)
# ----------------------------------------------------------------------------
def get_target_vectors(n_class, bit, p=0.5, seed=0):
    rng = np.random.default_rng(seed)
    tv = np.zeros((n_class, bit), dtype=np.float32)
    for _ in range(20):
        for index in range(n_class):
            ones = np.ones(bit, dtype=np.float32)
            sa = rng.choice(bit, int(bit * p), replace=False)
            ones[sa] = -1.0
            tv[index] = ones
    return jnp.asarray(tv)


def get_multi_label_random_center(bit, seed=1):
    rng = np.random.default_rng(seed)
    return jnp.asarray(rng.integers(0, 2, size=(1, bit)).astype(np.float32))


# ----------------------------------------------------------------------------
# Reference (plain JAX) for a quick sanity check
# ----------------------------------------------------------------------------
def _ref_loss(u, y, tv, rc, m, is_single_label, apply_t):
    u = u.astype(jnp.float32)
    if apply_t:
        u = (jnp.abs(u) > m).astype(jnp.float32) * jnp.sign(u)
    if is_single_label:
        t = tv[jnp.argmax(y, axis=1)]
    else:
        cs = y.astype(jnp.float32) @ tv
        cs = jnp.where(cs == 0.0, jnp.broadcast_to(rc, cs.shape), cs)
        t = 2.0 * (cs > 0.0).astype(jnp.float32) - 1.0
    return jnp.mean(jnp.maximum(m - u * t, 0.0))


# ----------------------------------------------------------------------------
if __name__ == "__main__":
    # "config": small shapes consistent with the module
    n_class, bit, num_train = 16, 32, 64
    N = 16                     # batch
    m = 0.1                    # config['m']
    apply_t = False            # '-T' not in config['info']

    target_vectors = get_target_vectors(n_class, bit, p=0.5)
    random_center = get_multi_label_random_center(bit)
    U0 = jnp.zeros((num_train, bit), jnp.float32)
    Y0 = jnp.zeros((num_train, n_class), jnp.float32)

    key = jax.random.PRNGKey(0)
    ku, kl, km = jax.random.split(key, 3)
    u = jax.random.normal(ku, (N, bit), jnp.float32)
    labels = jax.random.randint(kl, (N,), 0, n_class)
    y_single = jax.nn.one_hot(labels, n_class, dtype=jnp.float32)
    y_multi = (jax.random.uniform(km, (N, n_class)) < 0.3).astype(jnp.float32)
    ind = jnp.arange(N, dtype=jnp.int32)

    # single-label path (default for most datasets).  U/Y are donated, so
    # thread the state through successive calls.
    loss_s, U1, Y1 = dpn_loss_forward(
        u, y_single, ind, U0, Y0, target_vectors, random_center,
        m=m, is_single_label=True, apply_t=apply_t)
    # multi-label path (nuswide_21 / coco)
    loss_m, U2, Y2 = dpn_loss_forward(
        u, y_multi, ind, U1, Y1, target_vectors, random_center,
        m=m, is_single_label=False, apply_t=apply_t)

    jax.block_until_ready((loss_s, loss_m, U2, Y2))

    ref_s = _ref_loss(u, y_single, target_vectors, random_center, m, True, apply_t)
    ref_m = _ref_loss(u, y_multi, target_vectors, random_center, m, False, apply_t)
    np.testing.assert_allclose(np.asarray(loss_s), np.asarray(ref_s), rtol=1e-5, atol=1e-5)
    np.testing.assert_allclose(np.asarray(loss_m), np.asarray(ref_m), rtol=1e-5, atol=1e-5)
    np.testing.assert_allclose(np.asarray(U2[:N]), np.asarray(u), rtol=0, atol=0)

    print("KERNEL_OK")
</pallas_src>

<mosaic_0001>
module attributes {stable_mosaic.version = 11 : i64} {
  func.func @_single_onestep_kernel(%arg0: i32, %arg1: memref<8x128xf32, #tpu.memory_space<vmem>>, %arg2: memref<8x128xf32, #tpu.memory_space<vmem>>, %arg3: memref<1x1xf32, #tpu.memory_space<vmem>>) attributes {dimension_semantics = [#tpu.dimension_semantics<arbitrary>], iteration_bounds = array<i64: 1>, scalar_prefetch = 0 : i64, scratch_operands = 0 : i64, tpu.core_type = #tpu.core_type<tc>, window_params = [{transform_indices = @transform_0, window_bounds = array<i64: 8, 128>}, {transform_indices = @transform_1, window_bounds = array<i64: 8, 128>}, {pipeline_mode = #tpu.pipeline_mode<synchronous>, transform_indices = @transform_2, window_bounds = array<i64: 1, 1>}]} {
    %c0 = arith.constant 0 : index
    %c0_0 = arith.constant 0 : index
    %0 = vector.load %arg1[%c0, %c0_0] : memref<8x128xf32, #tpu.memory_space<vmem>>, vector<8x128xf32>
    %c0_1 = arith.constant 0 : index
    %c0_2 = arith.constant 0 : index
    %1 = vector.load %arg2[%c0_1, %c0_2] : memref<8x128xf32, #tpu.memory_space<vmem>>, vector<8x128xf32>
    %2 = arith.mulf %0, %1 : vector<8x128xf32>
    %cst = arith.constant 1.000000e-01 : f32
    %3 = vector.broadcast %cst : f32 to vector<8x128xf32>
    %4 = arith.subf %3, %2 : vector<8x128xf32>
    %cst_3 = arith.constant 0.000000e+00 : f32
    %5 = vector.broadcast %cst_3 : f32 to vector<8x128xf32>
    %6 = arith.maximumf %4, %5 : vector<8x128xf32>
    %7 = tpu.iota {dimensions = array<i32: 0>} : vector<8x128xi32>
    %c8_i32 = arith.constant 8 : i32
    %8 = arith.muli %arg0, %c8_i32 : i32
    %9 = vector.broadcast %8 : i32 to vector<8x128xi32>
    %10 = arith.addi %7, %9 : vector<8x128xi32>
    %11 = tpu.iota {dimensions = array<i32: 1>} : vector<8x128xi32>
    %c128_i32 = arith.constant 128 : i32
    %12 = vector.broadcast %c128_i32 : i32 to vector<8x128xi32>
    %13 = arith.muli %10, %12 : vector<8x128xi32>
    %14 = arith.addi %13, %11 : vector<8x128xi32>
    %c512_i32 = arith.constant 512 : i32
    %15 = vector.broadcast %c512_i32 : i32 to vector<8x128xi32>
    %16 = arith.cmpi slt, %14, %15 : vector<8x128xi32>
    %cst_4 = arith.constant 0.000000e+00 : f32
    %17 = vector.broadcast %cst_4 : f32 to vector<8x128xf32>
    %18 = arith.select %16, %6, %17 : vector<8x128xi1>, vector<8x128xf32>
    %19 = vector.shape_cast %18 : vector<8x128xf32> to vector<1x8x128xf32>
    %cst_5 = arith.constant dense<0.000000e+00> : vector<1xf32>
    %20 = vector.multi_reduction <add>, %19, %cst_5 [1, 2] : vector<1x8x128xf32> to vector<1xf32>
    %21 = vector.shape_cast %20 : vector<1xf32> to vector<1x1x1xf32>
    %22 = vector.extract %21[0, 0, 0] : f32 from vector<1x1x1xf32>
    %23 = vector.broadcast %22 : f32 to vector<1x1xf32>
    %c0_6 = arith.constant 0 : index
    %c0_7 = arith.constant 0 : index
    %24 = vector.load %arg3[%c0_6, %c0_7] : memref<1x1xf32, #tpu.memory_space<vmem>>, vector<1x1xf32>
    tpu.vector_store %arg3[%c0_6, %c0_7], %23 {strides = array<i32>} : memref<1x1xf32, #tpu.memory_space<vmem>>, vector<1x1xf32>,
    return
  }
  func.func @transform_0(%arg0: i32) -> (i32, i32) {
    %c0_i32 = arith.constant 0 : i32
    %c0_i32_0 = arith.constant 0 : i32
    return %arg0, %c0_i32 : i32, i32
  }
  func.func @transform_1(%arg0: i32) -> (i32, i32) {
    %c0_i32 = arith.constant 0 : i32
    %c0_i32_0 = arith.constant 0 : i32
    return %arg0, %c0_i32 : i32, i32
  }
  func.func @transform_2(%arg0: i32) -> (i32, i32) {
    %c0_i32 = arith.constant 0 : i32
    %c0_i32_0 = arith.constant 0 : i32
    %c0_i32_1 = arith.constant 0 : i32
    return %c0_i32, %c0_i32_0 : i32, i32
  }
}

</mosaic_0001>

<bundles_post_ra>
// kernel: dpn_loss_forward.1
= control target key start
LH: loop header
LB: loop body
LE: loop exit
PB: predicated region body
PF: predicated region fallthrough
CT: control target
= control target key end

     0   :  { %v17_v2 = vlaneseq  ;;  %s115_s0 = inlined_call_operand.vmem [shape: f32[8,128], index: 0, kind: input, shape index: {}]   ;;  %s116_s1 = inlined_call_operand.vmem [shape: f32[8,128], index: 1, kind: input, shape index: {}]   ;;  %s117_s2 = inlined_call_operand.hbm [shape: f32[1,1], index: 2, kind: output, shape index: {}]  }
   0x1   :  { %v12_v0 = vld [vmem:[%s115_s0] sm:$0xff] }
   0x2   :  { %v13_v1 = vld [vmem:[%s116_s1] sm:$0xff] }
   0x3   :  { %7 = vsyncpa [#allocation3], 0  ;;  %v14_v3 = vmul.f32 %v13_v1, %v12_v0  ;;  %v18_v4 = vshrl.u32 %v17_v2, 7  ;;  %v23_v5 = vand.u32 127, %v17_v2  ;;  %s81_s0 = smov [#allocation2]   ;;  %vm38_vm1 = vcmask 0  }
   0x4   :  { %s46_s1 = sshll.u32 %s81_s0, 4  ;;  %s47_s1 = int_to_ptr.vmem [resolvable:$true] %s46_s1 }
   0x5   :  { %v15_v6 = vsub.f32 0.1, %v14_v3  ;;  %v24_v7 = vmul.u32 128, %v18_v4  ;;  %s57_s14 = scalar_lea.vmem %s47_s1, 16  ;;  %s61_s15 = scalar_lea.vmem %s47_s1, 32 }
   0x6   :  { %p58_p0 = scmp.ne.s32.totalorder %s47_s1, %s57_s14  ;;  %p62_p1 = scmp.lt.s32.totalorder %s47_s1, %s47_s1 }
   0x7   :  { %v16_v8 = vmax.f32 %v15_v6, 0.0  ;;  %v25_v9 = vadd.s32 %v24_v7, %v23_v5  ;;  %p63_p2 = scmp.lt.s32.totalorder %s61_s15, %s57_s14 }
   0x9   :  { %vm26_vm0 = vcmp.lt.s32.totalorder %v25_v9, 512  ;;  %p64_p3 = por %p63_p2, %p62_p1 }
   0xa   :  { %v27_v10 = vsel %vm26_vm0, %v16_v8, 0.0 }
   0xb   :  { %28 = vadd.xlane.f32.xlu0 %v27_v10  ;;  %p65_p4 = pnand %p64_p3, %p58_p0 }
  0x98   :  { %v29_v11 = vpop.xlane.xlu0 %28 }
  0x99   :  { %v30_v12 = vrot.slane %v29_v11, 4 }
  0x9b   :  { %v31_v13 = vadd.f32 %v30_v12, %v29_v11 }
  0x9d   :  { %v32_v14 = vrot.slane %v31_v13, 2 }
  0x9f   :  { %v33_v15 = vadd.f32 %v32_v14, %v31_v13 }
  0xa1   :  { %v34_v16 = vrot.slane %v33_v15, 1 }
  0xa3   :  { %v35_v17 = vadd.f32 %v34_v16, %v33_v15 }
  0xa5   :  { %54 = vpush %v35_v17 }
  0xd6   :  { %s55_s13 = spop %54 }
  0xd7   :  { %v37_v18 = vstv %s55_s13 }
  0xd8   :  { %39 = vst.msk [vmem:[#allocation2] sm:$0x1] %vm38_vm1, %v37_v18 }
  0xd9   :  { %68 = shalt.err (!%p65_p4)
}
  0xda   :  { %s69_s18 = scalar_lea.hbm %s117_s2, 16 }
  0xdb   :  { %p70_p5 = scmp.ne.s32.totalorder %s117_s2, %s69_s18  ;;  %p73_p6 = scmp.lt.u32.totalorder %s69_s18, %s117_s2 }
  0xdd   :  { %p75_p7 = pnand %p73_p6, %p70_p5 }
  0xdf   :  { %78 = shalt.err (!%p75_p7)
}
  0xe0   :  { %49 = dma.vmem_to_hbm [thread:$0]  %s47_s1, 16, %s117_s2, [#allocation3]  }
  0xe1   :  { %79 = dma.done.wait [#allocation3], 16  }
  0xe2   :  { %80 = vsyncadd [#allocation3], 4294967280 }
  0xe3   :  { %53 = vsyncpa [#allocation3], 1 }

</bundles_post_ra>
